<compile_context>
chip_gen: v6e
topology: v6e:2x2x1
jax: 0.10.0
libtpu: 0.0.40
codegen_flags: <defaults>
</compile_context>

<pallas_src>
import functools

import jax
import jax.numpy as jnp
from jax.experimental import pallas as pl
from jax.experimental.pallas import tpu as pltpu


def _round_up(v, m):
    return ((v + m - 1) // m) * m


@functools.lru_cache(maxsize=1)
def _vmem_capacity_bytes():
    """Per-core VMEM capacity; conservative fallback if the query fails."""
    try:
        cap = int(getattr(pltpu.get_tpu_info(), "vmem_capacity_bytes", 0))
        if cap >= (16 << 20):
            return cap
    except Exception:
        pass
    return 64 << 20  # conservative: v7x per-TensorCore VMEM


def _plan_tiles(B, Fp, Hp, x_itm, mm_itm, out_itm, block_b):
    """Pick (TB, TH, nh, vmem_limit) so resident state fits per-core VMEM."""
    cap = _vmem_capacity_bytes()
    budget = int(cap * 0.85)  # leave headroom for compiler scratch

    # Batch tile: whole batch if it fits in one tile (full-dim blocks are
    # always legal), otherwise a sublane-aligned streaming tile.
    sublane = 16 if min(out_itm, mm_itm) == 2 else 8
    if B <= block_b:
        TB = B
    else:
        TB = max(sublane, (block_b // sublane) * sublane)

    def need(TH, wbuf):
        stream = 2 * TB * Fp * (x_itm + out_itm)           # dbl-buffered x / out tiles
        acc = TB * Fp * 4                                   # f32 accumulator scratch
        weights = wbuf * (2 * Fp * TH * mm_itm + (TH + Fp) * 4)
        inter = TB * TH * (4 + mm_itm) + TB * Fp * (4 + mm_itm)  # h, casts, partials
        return stream + acc + weights + inter

    # Smallest hidden-tiling factor (divisor of Hp/128) whose footprint fits.
    m = Hp // 128
    nh = None
    for d in [d for d in range(1, m + 1) if m % d == 0]:
        wbuf = 1 if d == 1 else 2  # resident weights single-buffered; tiled ones dbl
        if need(Hp // d, wbuf) <= budget:
            nh = d
            break
    if nh is None:
        # Even 128-wide hidden slabs don't fit the budget.
        # TODO(synk): also shrink TB / add an output-feature tiling axis for
        # extreme F; for now take the smallest slab and rely on the clamp.
        nh = m
    TH = Hp // nh

    # Limit computed with double-buffered weights (conservative) + margin.
    vmem_limit = int(need(TH, 2) * 1.5) + (4 << 20)
    vmem_limit = min(max(vmem_limit, 16 << 20), budget)
    return TB, TH, nh, vmem_limit


def projnet_kernel(x_ref, w1_ref, b1_ref, w2_ref, b2_ref, o_ref, acc_ref):
    # x_ref:  [TB, Fp]  (original input dtype; cast in-kernel)
    # w1_ref: [Fp, TH], b1_ref: [1, TH]   (weights in matmul dtype, biases f32)
    # w2_ref: [TH, Fp], b2_ref: [1, Fp]
    # o_ref:  [TB, Fp]; acc_ref: [TB, Fp] f32 scratch (partial sums over H tiles)
    j = pl.program_id(1)

    @pl.when(j == 0)
    def _init():
        acc_ref[...] = jnp.zeros_like(acc_ref)

    # First linear (MXU, f32 accumulation) + bias + ReLU in f32.
    # Single in-kernel cast of the streamed x tile to the matmul dtype.
    x = x_ref[...].astype(w1_ref.dtype)
    h = jnp.dot(x, w1_ref[...], preferred_element_type=jnp.float32)
    h = jnp.maximum(h + b1_ref[...], 0.0)

    # Partial product of the second linear over this hidden tile
    # (single downcast of the activation to the weight dtype).
    acc_ref[...] += jnp.dot(h.astype(w2_ref.dtype), w2_ref[...],
                            preferred_element_type=jnp.float32)

    @pl.when(j == pl.num_programs(1) - 1)
    def _finalize():
        o_ref[...] = jnp.maximum(acc_ref[...] + b2_ref[...], 0.0).astype(o_ref.dtype)


@functools.partial(jax.jit, static_argnames=("block_b", "matmul_dtype", "out_dtype"))
def projnet_forward(x, w1, b1, w2, b2, *, block_b=512, matmul_dtype=None,
                    out_dtype=None):
    """relu(relu(x @ w1 + b1) @ w2 + b2) as one fused Pallas kernel.

    x:  [B, F]
    w1: [F, H], b1: [H]    (H = F // 2)
    w2: [H, F], b2: [F]
    matmul_dtype: dtype of MXU operands (jnp.bfloat16 recommended on
      v5e/v6e/v7x; accumulation / bias-add / ReLU stay f32). Note the bf16
      path intentionally deviates slightly from the f32 PyTorch reference.
    out_dtype: output dtype (defaults to x.dtype); pass jnp.bfloat16 to halve
      output HBM traffic when downstream tolerates it.
    """
    B, F = x.shape
    H = w1.shape[1]
    mm_dtype = jnp.dtype(x.dtype if matmul_dtype is None else matmul_dtype)
    o_dtype = jnp.dtype(x.dtype if out_dtype is None else out_dtype)

    # Lane-dense feature padding (only where needed).
    Fp = _round_up(F, 128)
    Hp = _round_up(H, 128)

    x_itm = jnp.dtype(x.dtype).itemsize
    mm_itm = mm_dtype.itemsize
    out_itm = o_dtype.itemsize
    TB, TH, nh, vmem_limit = _plan_tiles(B, Fp, Hp, x_itm, mm_itm, out_itm, block_b)

    # x stays in its original dtype (cast happens in-kernel); pad its feature
    # dim only when not already lane-aligned. No batch padding at all.
    xp = x if Fp == F else jnp.pad(x, ((0, 0), (0, Fp - F)))
    # Weights/biases: tiny, one-time host-side pad + cast. Zero padding is
    # exact: padded hidden/output columns produce relu(0 + 0) = 0.
    w1p = jnp.pad(w1, ((0, Fp - F), (0, Hp - H))).astype(mm_dtype)
    w2p = jnp.pad(w2, ((0, Hp - H), (0, Fp - F))).astype(mm_dtype)
    b1p = jnp.pad(b1.reshape(1, H).astype(jnp.float32), ((0, 0), (0, Hp - H)))
    b2p = jnp.pad(b2.reshape(1, F).astype(jnp.float32), ((0, 0), (0, Fp - F)))

    grid = (pl.cdiv(B, TB), nh)

    # Resident operands (constant index_map) -> single buffer; hidden-tiled
    # weights (nh > 1) keep default double-buffering to pipeline their DMA.
    res = pl.Buffered(1)
    w_mode = res if nh == 1 else None

    cost = pl.CostEstimate(
        flops=4 * B * Fp * Hp,
        transcendentals=0,
        bytes_accessed=int(nh * B * Fp * x_itm
                           + 2 * Fp * Hp * mm_itm + (Hp + Fp) * 4
                           + B * Fp * out_itm),
    )

    out = pl.pallas_call(
        projnet_kernel,
        out_shape=jax.ShapeDtypeStruct((B, Fp), o_dtype),
        grid=grid,
        in_specs=[
            pl.BlockSpec((TB, Fp), lambda i, j: (i, 0)),                        # x (streamed)
            pl.BlockSpec((Fp, TH), lambda i, j: (0, j), pipeline_mode=w_mode),  # W1
            pl.BlockSpec((1, TH), lambda i, j: (0, j), pipeline_mode=w_mode),   # b1
            pl.BlockSpec((TH, Fp), lambda i, j: (j, 0), pipeline_mode=w_mode),  # W2
            pl.BlockSpec((1, Fp), lambda i, j: (0, 0), pipeline_mode=res),      # b2 (resident)
        ],
        out_specs=pl.BlockSpec((TB, Fp), lambda i, j: (i, 0)),
        scratch_shapes=[pltpu.VMEM((TB, Fp), jnp.float32)],
        compiler_params=pltpu.CompilerParams(
            dimension_semantics=("parallel", "arbitrary"),
            vmem_limit_bytes=vmem_limit,
        ),
        cost_estimate=cost,
    )(xp, w1p, b1p, w2p, b2p)

    return out if Fp == F else out[:, :F]


def init_projnet_params(key, feat_dim, dtype=jnp.float32):
    """Deterministic init matching nn.Linear's U(-1/sqrt(fan_in), 1/sqrt(fan_in))."""
    hidden = feat_dim // 2
    k1, k2, k3, k4 = jax.random.split(key, 4)
    bound1 = 1.0 / jnp.sqrt(feat_dim)
    bound2 = 1.0 / jnp.sqrt(hidden)
    # Stored as [in, out] (transpose of PyTorch's [out, in]).
    w1 = jax.random.uniform(k1, (feat_dim, hidden), dtype, -bound1, bound1)
    b1 = jax.random.uniform(k2, (hidden,), dtype, -bound1, bound1)
    w2 = jax.random.uniform(k3, (hidden, feat_dim), dtype, -bound2, bound2)
    b2 = jax.random.uniform(k4, (feat_dim,), dtype, -bound2, bound2)
    return w1, b1, w2, b2


if __name__ == "__main__":
    key = jax.random.PRNGKey(0)
    kx, kx2, kp = jax.random.split(key, 3)

    # Small demo shapes consistent with the module (hidden = feat_dim // 2).
    batch, feat_dim = 8, 32
    x = jax.random.normal(kx, (batch, feat_dim), dtype=jnp.float32)
    w1, b1, w2, b2 = init_projnet_params(kp, feat_dim)

    ref = jnp.maximum(jnp.maximum(x @ w1 + b1[None, :], 0.0) @ w2 + b2[None, :], 0.0)

    # f32 path (comparable with the PyTorch f32 reference).
    out = jax.block_until_ready(projnet_forward(x, w1, b1, w2, b2))
    assert out.shape == (batch, feat_dim)
    assert jnp.allclose(out, ref, atol=1e-4, rtol=1e-4)

    # Production path: bf16 MXU operands (cast in-kernel), f32 accumulation.
    out_bf = jax.block_until_ready(
        projnet_forward(x, w1, b1, w2, b2, matmul_dtype=jnp.bfloat16))
    assert jnp.allclose(out_bf, ref, atol=1e-1, rtol=1e-1)

    # Ragged batch (not a multiple of the tile) with multiple batch tiles:
    # exercises the cdiv grid and masked edge block (no batch padding).
    batch2 = 300
    x2 = jax.random.normal(kx2, (batch2, feat_dim), dtype=jnp.float32)
    ref2 = jnp.maximum(jnp.maximum(x2 @ w1 + b1[None, :], 0.0) @ w2 + b2[None, :], 0.0)
    out2 = jax.block_until_ready(projnet_forward(x2, w1, b1, w2, b2, block_b=128))
    assert out2.shape == (batch2, feat_dim)
    assert jnp.allclose(out2, ref2, atol=1e-4, rtol=1e-4)

    print("KERNEL_OK")
</pallas_src>

<mosaic_0001>
module attributes {stable_mosaic.version = 11 : i64} {
  func.func @projnet_kernel(%arg0: i32, %arg1: i32, %arg2: memref<8x128xf32, #tpu.memory_space<vmem>>, %arg3: memref<128x128xf32, #tpu.memory_space<vmem>>, %arg4: memref<1x128xf32, #tpu.memory_space<vmem>>, %arg5: memref<128x128xf32, #tpu.memory_space<vmem>>, %arg6: memref<1x128xf32, #tpu.memory_space<vmem>>, %arg7: memref<8x128xf32, #tpu.memory_space<vmem>>, %arg8: memref<8x128xf32, #tpu.memory_space<vmem>>) attributes {dimension_semantics = [#tpu.dimension_semantics<parallel>, #tpu.dimension_semantics<arbitrary>], iteration_bounds = array<i64: 1, 1>, scalar_prefetch = 0 : i64, scratch_operands = 1 : i64, tpu.core_type = #tpu.core_type<tc>, window_params = [{transform_indices = @transform_0, window_bounds = array<i64: 8, 128>}, {pipeline_mode = #tpu.pipeline_mode<synchronous>, transform_indices = @transform_1, window_bounds = array<i64: 128, 128>}, {pipeline_mode = #tpu.pipeline_mode<synchronous>, transform_indices = @transform_2, window_bounds = array<i64: 1, 128>}, {pipeline_mode = #tpu.pipeline_mode<synchronous>, transform_indices = @transform_3, window_bounds = array<i64: 128, 128>}, {pipeline_mode = #tpu.pipeline_mode<synchronous>, transform_indices = @transform_4, window_bounds = array<i64: 1, 128>}, {transform_indices = @transform_5, window_bounds = array<i64: 8, 128>}]} {
    %c0_i32 = arith.constant 0 : i32
    %0 = arith.cmpi eq, %arg1, %c0_i32 : i32
    %1 = arith.extui %0 : i1 to i32
    %c0_i32_0 = arith.constant 0 : i32
    %2 = arith.cmpi ne, %1, %c0_i32_0 : i32
    scf.if %2 {
      %cst_16 = arith.constant 0.000000e+00 : f32
      %19 = vector.broadcast %cst_16 : f32 to vector<8x128xf32>
      %c0_17 = arith.constant 0 : index
      %c0_18 = arith.constant 0 : index
      %20 = vector.load %arg8[%c0_17, %c0_18] : memref<8x128xf32, #tpu.memory_space<vmem>>, vector<8x128xf32>
      tpu.vector_store %arg8[%c0_17, %c0_18], %19 {strides = array<i32>} : memref<8x128xf32, #tpu.memory_space<vmem>>, vector<8x128xf32>,
    } else {
    }
    %c0 = arith.constant 0 : index
    %c0_1 = arith.constant 0 : index
    %3 = vector.load %arg2[%c0, %c0_1] : memref<8x128xf32, #tpu.memory_space<vmem>>, vector<8x128xf32>
    %c0_2 = arith.constant 0 : index
    %c0_3 = arith.constant 0 : index
    %4 = vector.load %arg3[%c0_2, %c0_3] : memref<128x128xf32, #tpu.memory_space<vmem>>, vector<128x128xf32>
    %cst = arith.constant dense<0.000000e+00> : vector<8x128xf32>
    %5 = tpu.matmul %3, %4, %cst {dimension_numbers = #tpu.dot_dimension_numbers<[1], [0], [0], [1], [0, 0, 1, 1], [], []>} : vector<8x128xf32>, vector<128x128xf32>, vector<8x128xf32> -> vector<8x128xf32>
    %c0_4 = arith.constant 0 : index
    %c0_5 = arith.constant 0 : index
    %6 = vector.load %arg4[%c0_4, %c0_5] : memref<1x128xf32, #tpu.memory_space<vmem>>, vector<1x128xf32>
    %7 = vector.broadcast %6 : vector<1x128xf32> to vector<8x128xf32>
    %8 = arith.addf %5, %7 : vector<8x128xf32>
    %cst_6 = arith.constant 0.000000e+00 : f32
    %9 = vector.broadcast %cst_6 : f32 to vector<8x128xf32>
    %10 = arith.maximumf %8, %9 : vector<8x128xf32>
    %c0_7 = arith.constant 0 : index
    %c0_8 = arith.constant 0 : index
    %11 = vector.load %arg8[%c0_7, %c0_8] : memref<8x128xf32, #tpu.memory_space<vmem>>, vector<8x128xf32>
    %c0_9 = arith.constant 0 : index
    %c0_10 = arith.constant 0 : index
    %12 = vector.load %arg5[%c0_9, %c0_10] : memref<128x128xf32, #tpu.memory_space<vmem>>, vector<128x128xf32>
    %cst_11 = arith.constant dense<0.000000e+00> : vector<8x128xf32>
    %13 = tpu.matmul %10, %12, %cst_11 {dimension_numbers = #tpu.dot_dimension_numbers<[1], [0], [0], [1], [0, 0, 1, 1], [], []>} : vector<8x128xf32>, vector<128x128xf32>, vector<8x128xf32> -> vector<8x128xf32>
    %14 = arith.addf %11, %13 : vector<8x128xf32>
    %c0_12 = arith.constant 0 : index
    %c0_13 = arith.constant 0 : index
    %15 = vector.load %arg8[%c0_12, %c0_13] : memref<8x128xf32, #tpu.memory_space<vmem>>, vector<8x128xf32>
    tpu.vector_store %arg8[%c0_12, %c0_13], %14 {strides = array<i32>} : memref<8x128xf32, #tpu.memory_space<vmem>>, vector<8x128xf32>,
    %c0_i32_14 = arith.constant 0 : i32
    %16 = arith.cmpi eq, %arg1, %c0_i32_14 : i32
    %17 = arith.extui %16 : i1 to i32
    %c0_i32_15 = arith.constant 0 : i32
    %18 = arith.cmpi ne, %17, %c0_i32_15 : i32
    scf.if %18 {
      %c0_16 = arith.constant 0 : index
      %c0_17 = arith.constant 0 : index
      %19 = vector.load %arg8[%c0_16, %c0_17] : memref<8x128xf32, #tpu.memory_space<vmem>>, vector<8x128xf32>
      %c0_18 = arith.constant 0 : index
      %c0_19 = arith.constant 0 : index
      %20 = vector.load %arg6[%c0_18, %c0_19] : memref<1x128xf32, #tpu.memory_space<vmem>>, vector<1x128xf32>
      %21 = vector.broadcast %20 : vector<1x128xf32> to vector<8x128xf32>
      %22 = arith.addf %19, %21 : vector<8x128xf32>
      %cst_20 = arith.constant 0.000000e+00 : f32
      %23 = vector.broadcast %cst_20 : f32 to vector<8x128xf32>
      %24 = arith.maximumf %22, %23 : vector<8x128xf32>
      %c0_21 = arith.constant 0 : index
      %c0_22 = arith.constant 0 : index
      %25 = vector.load %arg7[%c0_21, %c0_22] : memref<8x128xf32, #tpu.memory_space<vmem>>, vector<8x128xf32>
      tpu.vector_store %arg7[%c0_21, %c0_22], %24 {strides = array<i32>} : memref<8x128xf32, #tpu.memory_space<vmem>>, vector<8x128xf32>,
    } else {
    }
    return
  }
  func.func @transform_0(%arg0: i32, %arg1: i32) -> (i32, i32) {
    %c0_i32 = arith.constant 0 : i32
    %c0_i32_0 = arith.constant 0 : i32
    return %arg0, %c0_i32 : i32, i32
  }
  func.func @transform_1(%arg0: i32, %arg1: i32) -> (i32, i32) {
    %c0_i32 = arith.constant 0 : i32
    %c0_i32_0 = arith.constant 0 : i32
    return %c0_i32, %arg1 : i32, i32
  }
  func.func @transform_2(%arg0: i32, %arg1: i32) -> (i32, i32) {
    %c0_i32 = arith.constant 0 : i32
    %c0_i32_0 = arith.constant 0 : i32
    return %c0_i32, %arg1 : i32, i32
  }
  func.func @transform_3(%arg0: i32, %arg1: i32) -> (i32, i32) {
    %c0_i32 = arith.constant 0 : i32
    %c0_i32_0 = arith.constant 0 : i32
    return %arg1, %c0_i32 : i32, i32
  }
  func.func @transform_4(%arg0: i32, %arg1: i32) -> (i32, i32) {
    %c0_i32 = arith.constant 0 : i32
    %c0_i32_0 = arith.constant 0 : i32
    %c0_i32_1 = arith.constant 0 : i32
    return %c0_i32, %c0_i32_0 : i32, i32
  }
  func.func @transform_5(%arg0: i32, %arg1: i32) -> (i32, i32) {
    %c0_i32 = arith.constant 0 : i32
    %c0_i32_0 = arith.constant 0 : i32
    return %arg0, %c0_i32 : i32, i32
  }
}

</mosaic_0001>

<bundles_post_ra>
// kernel: projnet_forward.1
= control target key start
LH: loop header
LB: loop body
LE: loop exit
PB: predicated region body
PF: predicated region fallthrough
CT: control target
= control target key end

     0   :  { %v369_v1 = vmov 0.0   ;;  %vm370_vm0 = vmmov 0   ;;  %s544_s0 = inlined_call_operand.vmem [shape: f32[8,128], index: 0, kind: input, shape index: {}]   ;;  %s545_s1 = inlined_call_operand.vmem [shape: f32[128,128], index: 1, kind: input, shape index: {}]   ;;  %s546_s2 = inlined_call_operand.vmem [shape: f32[1,128], index: 2, kind: input, shape index: {}]   ;;  %s547_s3 = inlined_call_operand.vmem [shape: f32[128,128], index: 3, kind: input, shape index: {}]   ;;  %s548_s4 = inlined_call_operand.vmem [shape: f32[1,128], index: 4, kind: input, shape index: {}]   ;;  %s549_s5 = inlined_call_operand.hbm [shape: f32[8,128], index: 5, kind: output, shape index: {}]  }
   0x1   :  { %v42_v0 = vld [vmem:[%s545_s1 + $0x78] sm:$0xff]  ;;  %274 = vmatprep.subr.mxu0 %v369_v1  ;;  %v41_v2 = vld [vmem:[%s545_s1 + $0x70] sm:$0xff]  ;;  %306 = vmatprep.mubr.msk.f32.mxu0 %vm370_vm0, %v369_v1  ;;  %v40_v3 = vld [vmem:[%s545_s1 + $0x68] sm:$0xff] }
   0x2   :  { %275 = vmatpush3.msra.mxu0 %v42_v0  ;;  %309 = vmatprep.subr.mxu1 %v369_v1  ;;  %v39_v4 = vld [vmem:[%s545_s1 + $0x60] sm:$0xff]  ;;  %v137_v5 = vld [vmem:[%s547_s3 + $0x78] sm:$0xff]  ;;  %v136_v6 = vld [vmem:[%s547_s3 + $0x70] sm:$0xff] }
   0x3   :  { %276 = vmatprep.subr.mxu0 %v369_v1  ;;  %341 = vmatprep.mubr.msk.f32.mxu1 %vm370_vm0, %v369_v1  ;;  %v38_v7 = vld [vmem:[%s545_s1 + $0x58] sm:$0xff]  ;;  %v135_v8 = vld [vmem:[%s547_s3 + $0x68] sm:$0xff]  ;;  %v37_v9 = vld [vmem:[%s545_s1 + $0x50] sm:$0xff] }
   0x4   :  { %277 = vmatpush3.msra.mxu0 %v41_v2  ;;  %310 = vmatpush3.msra.mxu1 %v137_v5  ;;  %v134_v10 = vld [vmem:[%s547_s3 + $0x60] sm:$0xff] }
   0x5   :  { %278 = vmatprep.subr.mxu0 %v369_v1  ;;  %311 = vmatprep.subr.mxu1 %v369_v1 }
   0x6   :  { %279 = vmatpush3.msra.mxu0 %v40_v3  ;;  %312 = vmatpush3.msra.mxu1 %v136_v6 }
   0x7   :  { %280 = vmatprep.subr.mxu0 %v369_v1  ;;  %313 = vmatprep.subr.mxu1 %v369_v1 }
   0x8   :  { %281 = vmatpush3.msra.mxu0 %v39_v4  ;;  %314 = vmatpush3.msra.mxu1 %v135_v8 }
   0x9   :  { %282 = vmatprep.subr.mxu0 %v369_v1 }
   0xa   :  { %283 = vmatpush3.msra.mxu0 %v38_v7 }
   0xb   :  { %10 = vsyncpa [#allocation4], 0  ;;  %284 = vmatprep.subr.mxu0 %v369_v1  ;;  %v36_v11 = vld [vmem:[%s545_s1 + $0x48] sm:$0xff]  ;;  %315 = vmatprep.subr.mxu1 %v369_v1  ;;  %v133_v12 = vld [vmem:[%s547_s3 + $0x58] sm:$0xff]  ;;  %s371_s11 = smov [#allocation3]  }
   0xc   :  { %285 = vmatpush3.msra.mxu0 %v37_v9  ;;  %316 = vmatpush3.msra.mxu1 %v134_v10  ;;  %v35_v13 = vld [vmem:[%s545_s1 + $0x40] sm:$0xff]  ;;  %v132_v14 = vld [vmem:[%s547_s3 + $0x50] sm:$0xff]  ;;  %v34_v15 = vld [vmem:[%s545_s1 + $0x38] sm:$0xff]  ;;  %s230_s12 = sshll.u32 %s371_s11, 4  ;;  %s231_s12 = int_to_ptr.vmem [resolvable:$true] %s230_s12 }
   0xd   :  { %286 = vmatprep.subr.mxu0 %v369_v1  ;;  %317 = vmatprep.subr.mxu1 %v369_v1  ;;  %v131_v16 = vld [vmem:[%s547_s3 + $0x48] sm:$0xff]  ;;  %v33_v17 = vld [vmem:[%s545_s1 + $0x30] sm:$0xff]  ;;  %v130_v18 = vld [vmem:[%s547_s3 + $0x40] sm:$0xff]  ;;  %p352_p1 = scmp.lt.s32.totalorder %s231_s12, %s231_s12 }
   0xe   :  { %287 = vmatpush3.msra.mxu0 %v36_v11  ;;  %318 = vmatpush3.msra.mxu1 %v133_v12  ;;  %v32_v19 = vld [vmem:[%s545_s1 + $0x28] sm:$0xff]  ;;  %v129_v20 = vld [vmem:[%s547_s3 + $0x38] sm:$0xff]  ;;  %v31_v21 = vld [vmem:[%s545_s1 + $0x20] sm:$0xff] }
   0xf   :  { %288 = vmatprep.subr.mxu0 %v369_v1  ;;  %319 = vmatprep.subr.mxu1 %v369_v1  ;;  %v128_v22 = vld [vmem:[%s547_s3 + $0x30] sm:$0xff]  ;;  %v30_v23 = vld [vmem:[%s545_s1 + $0x18] sm:$0xff]  ;;  %v127_v24 = vld [vmem:[%s547_s3 + $0x28] sm:$0xff] }
  0x10   :  { %289 = vmatpush3.msra.mxu0 %v35_v13  ;;  %320 = vmatpush3.msra.mxu1 %v132_v14  ;;  %v29_v25 = vld [vmem:[%s545_s1 + $0x10] sm:$0xff]  ;;  %v126_v26 = vld [vmem:[%s547_s3 + $0x20] sm:$0xff]  ;;  %v28_v27 = vld [vmem:[%s545_s1 + $0x8] sm:$0xff] }
  0x11   :  { %290 = vmatprep.subr.mxu0 %v369_v1  ;;  %321 = vmatprep.subr.mxu1 %v369_v1  ;;  %v125_v28 = vld [vmem:[%s547_s3 + $0x18] sm:$0xff]  ;;  %v27_v29 = vld [vmem:[%s545_s1] sm:$0xff]  ;;  %v124_v31 = vld [vmem:[%s547_s3 + $0x10] sm:$0xff] }
  0x12   :  { %291 = vmatpush3.msra.mxu0 %v34_v15  ;;  %322 = vmatpush3.msra.mxu1 %v131_v16  ;;  %v26_v30 = vld [vmem:[%s544_s0] sm:$0xff]  ;;  %v123_v32 = vld [vmem:[%s547_s3 + $0x8] sm:$0xff] }
  0x13   :  { %292 = vmatprep.subr.mxu0 %v369_v1  ;;  %323 = vmatprep.subr.mxu1 %v369_v1  ;;  %v122_v33 = vld [vmem:[%s547_s3] sm:$0xff]  ;;  %s347_s3 = scalar_lea.vmem %s231_s12, 128 }
  0x14   :  { %293 = vmatpush3.msra.mxu0 %v33_v17  ;;  %324 = vmatpush3.msra.mxu1 %v130_v18  ;;  %v238_v34 = vld [vmem:[%s546_s2] ss:$0 sm:$0xff]  ;;  %p348_p0 = scmp.ne.s32.totalorder %s231_s12, %s347_s3  ;;  %p353_p2 = scmp.lt.s32.totalorder %s347_s3, %s347_s3 }
  0x15   :  { %294 = vmatprep.subr.mxu0 %v369_v1  ;;  %325 = vmatprep.subr.mxu1 %v369_v1  ;;  %v239_v39 = vld [vmem:[%s548_s4] ss:$0 sm:$0xff] }
  0x16   :  { %295 = vmatpush3.msra.mxu0 %v32_v19  ;;  %326 = vmatpush3.msra.mxu1 %v129_v20  ;;  %p354_p3 = por %p353_p2, %p352_p1 }
  0x17   :  { %296 = vmatprep.subr.mxu0 %v369_v1  ;;  %327 = vmatprep.subr.mxu1 %v369_v1 }
  0x18   :  { %297 = vmatpush3.msra.mxu0 %v31_v21  ;;  %328 = vmatpush3.msra.mxu1 %v128_v22  ;;  %p355_p4 = pnand %p354_p3, %p348_p0 }
  0x19   :  { %298 = vmatprep.subr.mxu0 %v369_v1  ;;  %329 = vmatprep.subr.mxu1 %v369_v1 }
  0x1a   :  { %299 = vmatpush3.msra.mxu0 %v30_v23  ;;  %330 = vmatpush3.msra.mxu1 %v127_v24 }
  0x1b   :  { %300 = vmatprep.subr.mxu0 %v369_v1  ;;  %331 = vmatprep.subr.mxu1 %v369_v1 }
  0x1c   :  { %301 = vmatpush3.msra.mxu0 %v29_v25  ;;  %332 = vmatpush3.msra.mxu1 %v126_v26 }
  0x1d   :  { %302 = vmatprep.subr.mxu0 %v369_v1  ;;  %333 = vmatprep.subr.mxu1 %v369_v1 }
  0x1e   :  { %303 = vmatpush3.msra.mxu0 %v28_v27  ;;  %334 = vmatpush3.msra.mxu1 %v125_v28 }
  0x1f   :  { %304 = vmatprep.subr.mxu0 %v369_v1  ;;  %335 = vmatprep.subr.mxu1 %v369_v1 }
  0x20   :  { %305 = vmatpush3.msra.mxu0 %v27_v29  ;;  %336 = vmatpush3.msra.mxu1 %v124_v31 }
  0x21   :  { %307 = vmatmul.mubr.f32.vlgmr.msra.gmra.mxu0 %v26_v30  ;;  %337 = vmatprep.subr.mxu1 %v369_v1 }
  0x22   :  { %338 = vmatpush3.msra.mxu1 %v123_v32 }
  0x23   :  { %339 = vmatprep.subr.mxu1 %v369_v1 }
  0x24   :  { %340 = vmatpush3.msra.mxu1 %v122_v33 }
  0xe1   :  { %v116_v35 = vpop.f32.mrf.mxu0 }
  0xe2   :  { %v117_v36 = vadd.f32 %v238_v34, %v116_v35 }
  0xe3   :  { %v308_v37 = vpop.f32.mrf.mxu0 }
  0xe4   :  { %v120_v38 = vmax.f32 %v117_v36, 0.0 }
  0xe6   :  { %342 = vmatmul.mubr.f32.vlgmr.msra.gmra.mxu1 %v120_v38 }
 0x1a6   :  { %v204_v40 = vpop.f32.mrf.mxu1 }
 0x1a7   :  { %v221_v41 = vadd.f32 %v239_v39, %v204_v40 }
 0x1a8   :  { %v343_v42 = vpop.f32.mrf.mxu1 }
 0x1a9   :  { %v222_v43 = vmax.f32 %v221_v41, 0.0 }
 0x1ab   :  { %223 = vst [vmem:[#allocation3] sm:$0xff] %v222_v43 }
 0x1ac   :  { %358 = shalt.err (!%p355_p4)
}
 0x1ad   :  { %233 = dma.vmem_to_hbm [thread:$0]  %s231_s12, 128, %s549_s5, [#allocation4]  }
 0x1ae   :  { %367 = dma.done.wait [#allocation4], 128  }
 0x1af   :  { %368 = vsyncadd [#allocation4], 4294967168 }
 0x1b0   :  { %237 = vsyncpa [#allocation4], 1 }

</bundles_post_ra>
